<compile_context>
chip_gen: v7x
topology: tpu7x:2x2x1
jax: 0.10.0
libtpu: 0.0.40
codegen_flags: <defaults>
</compile_context>

<pallas_src>
import jax
import jax.numpy as jnp
from jax.experimental import pallas as pl
from jax.experimental.pallas import tpu as pltpu


def diag_gaussian_mean_kernel(x_ref, w_ref, b_ref, mean_ref):
    # MXU matmul with f32 accumulation + bias add. Output block's last dim is
    # the full num_outputs extent (masked stores; DMA-bound so this is fine).
    mean = jnp.dot(x_ref[...], w_ref[...], preferred_element_type=jnp.float32)
    mean_ref[...] = (mean + b_ref[...]).astype(mean_ref.dtype)


def _round_up(v, m):
    return ((v + m - 1) // m) * m


def diag_gaussian_forward(x, w_t, b, logstd, *, block_b=4096, force_pallas=False):
    """Returns (loc, scale) of the diagonal Gaussian.

    x:      [B, num_inputs]            float32
    w_t:    [num_inputs, num_outputs]  (transposed Linear weight)
    b:      [1, num_outputs]           Linear bias
    logstd: [1, num_outputs]           AddBias parameter (log std)

    scale is returned with shape (1, num_outputs); broadcast over the batch by
    the consumer (same semantics as the original module's exp(logstd) bias).
    """
    B, num_inputs = x.shape
    _, num_outputs = w_t.shape

    # scale is x-independent and rank-1: never materialize a (B, N) copy.
    scale = jnp.exp(logstd)

    # Tiny batches: a standalone pallas_call is 100% launch overhead; let XLA
    # fuse matmul+bias instead (or fuse this head upstream — see TODO above).
    if B < 1024 and not force_pallas:
        return x @ w_t + b, scale

    # Batch tile: large (amortizes the ~0.35 us per-step pipeline overhead) but
    # capped at ~B/2 (rounded up to a multiple of 8) so the grid has >= 2 steps
    # and both v7x TensorCores get work on the "parallel" batch axis.
    tb = min(block_b, max(8, _round_up(pl.cdiv(B, 2), 8)))
    grid = (pl.cdiv(B, tb),)

    loc = pl.pallas_call(
        diag_gaussian_mean_kernel,
        out_shape=jax.ShapeDtypeStruct((B, num_outputs), jnp.float32),
        grid=grid,
        in_specs=[
            pl.BlockSpec((tb, num_inputs), lambda i: (i, 0)),          # x tile
            pl.BlockSpec((num_inputs, num_outputs), lambda i: (0, 0)),  # W^T (VMEM-resident)
            pl.BlockSpec((1, num_outputs), lambda i: (0, 0)),           # bias (VMEM-resident)
        ],
        out_specs=pl.BlockSpec((tb, num_outputs), lambda i: (i, 0)),
        compiler_params=pltpu.CompilerParams(
            dimension_semantics=("parallel",),
        ),
    )(x, w_t, b)

    return loc, scale


def make_params(num_inputs, num_outputs, key):
    """Deterministic parameter init matching DiagGaussian.__init__ semantics."""
    # fc_mean: Linear(num_inputs, num_outputs), orthogonal weight, zero bias.
    w = jax.nn.initializers.orthogonal()(key, (num_outputs, num_inputs), jnp.float32)
    w_t = jnp.transpose(w)                                # [num_inputs, num_outputs]
    b = jnp.zeros((1, num_outputs), jnp.float32)          # Linear bias (const 0 init)
    logstd = jnp.zeros((1, num_outputs), jnp.float32)     # AddBias(torch.zeros(N))
    return w_t, b, logstd


if __name__ == "__main__":
    num_inputs = 32
    num_outputs = 16

    key = jax.random.PRNGKey(0)
    kx, kw, kx2 = jax.random.split(key, 3)
    w_t, b, logstd = make_params(num_inputs, num_outputs, kw)

    # --- small-batch check (forces the Pallas path; grid = (1,)) ---
    batch = 8
    x = jax.random.normal(kx, (batch, num_inputs), dtype=jnp.float32)
    loc, scale = diag_gaussian_forward(x, w_t, b, logstd, force_pallas=True)
    jax.block_until_ready((loc, scale))

    ref_loc = x @ w_t + b
    ref_scale = jnp.exp(logstd)
    assert loc.shape == (batch, num_outputs)
    assert scale.shape == (1, num_outputs)
    assert jnp.allclose(loc, ref_loc, atol=1e-5, rtol=1e-5)
    assert jnp.allclose(scale, ref_scale, atol=1e-6, rtol=1e-6)
    # Broadcast semantics match the original module's (B, N) action_logstd.exp().
    assert jnp.allclose(
        jnp.broadcast_to(scale, (batch, num_outputs)),
        jnp.exp(jnp.broadcast_to(logstd, (batch, num_outputs))),
    )

    # --- multi-step check (grid >= 2 and a partial final block via masking) ---
    batch2 = 72
    x2 = jax.random.normal(kx2, (batch2, num_inputs), dtype=jnp.float32)
    loc2, scale2 = diag_gaussian_forward(x2, w_t, b, logstd, force_pallas=True)
    jax.block_until_ready((loc2, scale2))
    assert loc2.shape == (batch2, num_outputs)
    assert jnp.allclose(loc2, x2 @ w_t + b, atol=1e-5, rtol=1e-5)
    assert jnp.allclose(scale2, ref_scale, atol=1e-6, rtol=1e-6)

    print("KERNEL_OK")
</pallas_src>

<mosaic_0001>
module attributes {stable_mosaic.version = 11 : i64} {
  func.func @diag_gaussian_mean_kernel(%arg0: i32, %arg1: memref<8x32xf32, #tpu.memory_space<vmem>>, %arg2: memref<32x16xf32, #tpu.memory_space<vmem>>, %arg3: memref<1x16xf32, #tpu.memory_space<vmem>>, %arg4: memref<8x16xf32, #tpu.memory_space<vmem>>) attributes {dimension_semantics = [#tpu.dimension_semantics<parallel>], iteration_bounds = array<i64: 1>, scalar_prefetch = 0 : i64, scratch_operands = 0 : i64, tpu.core_type = #tpu.core_type<tc>, window_params = [{transform_indices = @transform_0, window_bounds = array<i64: 8, 32>}, {pipeline_mode = #tpu.pipeline_mode<synchronous>, transform_indices = @transform_1, window_bounds = array<i64: 32, 16>}, {pipeline_mode = #tpu.pipeline_mode<synchronous>, transform_indices = @transform_2, window_bounds = array<i64: 1, 16>}, {transform_indices = @transform_3, window_bounds = array<i64: 8, 16>}]} {
    %c0 = arith.constant 0 : index
    %c0_0 = arith.constant 0 : index
    %0 = vector.load %arg1[%c0, %c0_0] : memref<8x32xf32, #tpu.memory_space<vmem>>, vector<8x32xf32>
    %c0_1 = arith.constant 0 : index
    %c0_2 = arith.constant 0 : index
    %1 = vector.load %arg2[%c0_1, %c0_2] : memref<32x16xf32, #tpu.memory_space<vmem>>, vector<32x16xf32>
    %cst = arith.constant dense<0.000000e+00> : vector<8x16xf32>
    %2 = tpu.matmul %0, %1, %cst {dimension_numbers = #tpu.dot_dimension_numbers<[1], [0], [0], [1], [0, 0, 1, 1], [], []>} : vector<8x32xf32>, vector<32x16xf32>, vector<8x16xf32> -> vector<8x16xf32>
    %c0_3 = arith.constant 0 : index
    %c0_4 = arith.constant 0 : index
    %3 = vector.load %arg3[%c0_3, %c0_4] : memref<1x16xf32, #tpu.memory_space<vmem>>, vector<1x16xf32>
    %4 = vector.broadcast %3 : vector<1x16xf32> to vector<8x16xf32>
    %5 = arith.addf %2, %4 : vector<8x16xf32>
    %c0_5 = arith.constant 0 : index
    %c0_6 = arith.constant 0 : index
    %6 = vector.load %arg4[%c0_5, %c0_6] : memref<8x16xf32, #tpu.memory_space<vmem>>, vector<8x16xf32>
    tpu.vector_store %arg4[%c0_5, %c0_6], %5 {strides = array<i32>} : memref<8x16xf32, #tpu.memory_space<vmem>>, vector<8x16xf32>,
    return
  }
  func.func @transform_0(%arg0: i32) -> (i32, i32) {
    %c0_i32 = arith.constant 0 : i32
    %c0_i32_0 = arith.constant 0 : i32
    return %arg0, %c0_i32 : i32, i32
  }
  func.func @transform_1(%arg0: i32) -> (i32, i32) {
    %c0_i32 = arith.constant 0 : i32
    %c0_i32_0 = arith.constant 0 : i32
    %c0_i32_1 = arith.constant 0 : i32
    return %c0_i32, %c0_i32_0 : i32, i32
  }
  func.func @transform_2(%arg0: i32) -> (i32, i32) {
    %c0_i32 = arith.constant 0 : i32
    %c0_i32_0 = arith.constant 0 : i32
    %c0_i32_1 = arith.constant 0 : i32
    return %c0_i32, %c0_i32_0 : i32, i32
  }
  func.func @transform_3(%arg0: i32) -> (i32, i32) {
    %c0_i32 = arith.constant 0 : i32
    %c0_i32_0 = arith.constant 0 : i32
    return %arg0, %c0_i32 : i32, i32
  }
}

</mosaic_0001>

<bundles_post_ra>
// kernel: tpu_custom_call.1
= control target key start
LH: loop header
LB: loop body
LE: loop exit
PB: predicated region body
PF: predicated region fallthrough
CT: control target
= control target key end

     0   :  { %v169_v3 = vmov 0.0|0.0   ;;  %vm170_vm0 = vmmov 0   ;;  %v171_v6 = vmov 0.0   ;;  %s223_s0 = inlined_call_operand.vmem [shape: f32[8,32], index: 0, kind: input, shape index: {}]   ;;  %s224_s1 = inlined_call_operand.vmem [shape: f32[32,16], index: 1, kind: input, shape index: {}]   ;;  %s225_s2 = inlined_call_operand.vmem [shape: f32[1,16], index: 2, kind: input, shape index: {}]   ;;  %s226_s3 = inlined_call_operand.hbm [shape: f32[8,16], index: 3, kind: output, shape index: {}]  }
   0x1   :  { %v16_v0 = vld [vmem:[%s224_s1] sm:$0xff]  ;;  %v17_v1 = vld [vmem:[%s224_s1 + $0x8] sm:$0xff]  ;;  %v18_v2 = vld [vmem:[%s224_s1 + $0x10] sm:$0xff]  ;;  %135 = vmatprep.subr.bf16.mxu0 %v169_v3  ;;  %132 = vmatprep.mubr.msk.f32.mxu0 %vm170_vm0, %v171_v6 }
   0x2   :  { %v136_v4 = vpack.c.bf16 %v17_v1, %v16_v0  ;;  %v19_v5 = vld [vmem:[%s224_s1 + $0x18] sm:$0xff] }
   0x3   :  { %8 = vsyncpa [#allocation3], 0  ;;  %v139_v7 = vpack.c.bf16 %v19_v5, %v18_v2  ;;  %v15_v8 = vld [vmem:[%s223_s0] sm:$0xff]  ;;  %vm27_vm1 = vcmask 261120   ;;  %s172_s24 = smov [#allocation2]   ;;  %vm101_vm2 = vcmask 130048  }
   0x4   :  { %137 = vmatpush3.bf16.msra.mxu0 %v136_v4  ;;  %v117_v9 = vld [vmem:[%s225_s2] ss:$0 sm:$0xff]  ;;  %s109_s1 = sshll.u32 %s172_s24, 4  ;;  %s110_s1 = int_to_ptr.vmem [resolvable:$true] %s109_s1 }
   0x5   :  { %138 = vmatprep.subr.bf16.mxu0 %v169_v3  ;;  %s145_s25 = scalar_lea.vmem %s110_s1, 128  ;;  %p150_p1 = scmp.lt.s32.totalorder %s110_s1, %s110_s1 }
   0x6   :  { %p146_p0 = scmp.ne.s32.totalorder %s110_s1, %s145_s25  ;;  %p151_p2 = scmp.lt.s32.totalorder %s145_s25, %s145_s25 }
   0x8   :  { %140 = vmatpush3.bf16.msra.mxu0 %v139_v7  ;;  %p152_p3 = por %p151_p2, %p150_p1 }
   0xa   :  { %p153_p4 = pnand %p152_p3, %p146_p0 }
   0xb   :  { %133 = vmatmul.mubr.msk.f32.vlgmr.msra.gmra.mrb[0].mxu0 %vm27_vm1, %v15_v8 }
  0xde   :  { %v97_v10 = vpop.f32.mrb[0].mxu0 }
  0xdf   :  { %v98_v11 = vadd.f32 %v117_v9, %v97_v10  ;;  %v134_v12 = vpop.f32.mrb[1].mxu0 }
  0xe1   :  { %102 = vst.msk [vmem:[#allocation2] sm:$0xff] %vm101_vm2, %v98_v11 }
  0xe2   :  { %156 = shalt.err (!%p153_p4)
}
  0xe3   :  { %s157_s27 = scalar_lea.hbm %s226_s3, 128 }
  0xe4   :  { %p158_p5 = scmp.ne.s32.totalorder %s226_s3, %s157_s27  ;;  %p161_p6 = scmp.lt.u32.totalorder %s157_s27, %s226_s3 }
  0xe6   :  { %p163_p7 = pnand %p161_p6, %p158_p5 }
  0xe8   :  { %166 = shalt.err (!%p163_p7)
}
  0xe9   :  { %112 = dma.vmem_to_hbm [thread:$0]  %s110_s1, 128, %s226_s3, [#allocation3]  }
  0xea   :  { %167 = dma.done.wait [#allocation3], 128  }
  0xeb   :  { %168 = vsyncadd [#allocation3], 4294967168 }
  0xec   :  { %116 = vsyncpa [#allocation3], 1 }

</bundles_post_ra>
